<compile_context>
chip_gen: v7x
topology: tpu7x:2x2x1
jax: 0.10.0
libtpu: 0.0.40
codegen_flags: <defaults>
</compile_context>

<pallas_src>
import numpy as np
import jax
import jax.numpy as jnp
from jax.experimental import pallas as pl
from jax.experimental.pallas import tpu as pltpu

NUM_CLASSES = 39
ADAPT = 38
FC1_IN = 128 * ADAPT * ADAPT      # 184832, fixed by the module definition
FC1_OUT = 128

_CONV_LAYERS = ((1, 32), (2, 64), (3, 128))   # (layer index, Cout)
_TM_TARGET = 512                  # >=512-row tiles hit ~85% of HBM roofline
_SUBLANE = 16                     # bf16 sublane packing
_FC_TK = 2048                     # fc1 K-reduction tile
_VMEM_LIMIT = 32 * 1024 * 1024    # fits v5e/v6e/v7x scoped-VMEM budgets


def _round_up(x, m):
    return ((x + m - 1) // m) * m


# ----------------------------- Pallas kernels ------------------------------

def conv_pool_relu_kernel(xcol_ref, w_ref, b_ref, o_ref):
    # xcol_ref: (4, TM, G*K) bf16  pool-tap-major, pixel-packed im2col rows.
    #           Tap block t (t = a*2+b of the 2x2 pool window) holds, for each
    #           packed output row, the 3x3xCin features of G consecutive
    #           pooled pixels at input offset (a, b).
    # w_ref:    (G*K, 128)  bf16  block-diagonal conv weight (G x (K, Cout)).
    # b_ref:    (1, 128)    f32   conv bias tiled G times along lanes.
    # o_ref:    (TM, 128)   bf16  relu(maxpool2x2(conv(x))), lane-dense rows.
    w = w_ref[...]
    y0 = jnp.dot(xcol_ref[0], w, preferred_element_type=jnp.float32)
    y1 = jnp.dot(xcol_ref[1], w, preferred_element_type=jnp.float32)
    y2 = jnp.dot(xcol_ref[2], w, preferred_element_type=jnp.float32)
    y3 = jnp.dot(xcol_ref[3], w, preferred_element_type=jnp.float32)
    # VPU max over the 4 pool taps; bias after the max (exact: max commutes
    # with a per-channel constant add) -> 4x less VALU work than bias-first.
    p = jnp.maximum(jnp.maximum(y0, y1), jnp.maximum(y2, y3))
    o_ref[...] = jnp.maximum(p + b_ref[...], 0.0).astype(o_ref.dtype)


def fc_head_kernel(x_ref, w1_ref, b1_ref, w2_ref, b2_ref, o_ref, acc_ref):
    # Streams K-tiles of the folded fc1 weight; f32 accumulator in VMEM.
    # x_ref:  (B, TK)    bf16   post-conv3 features (NHWC-flat), K-tile
    # w1_ref: (TK, 128)  bf16   folded (adaptive_pool+flatten+fc1) weight tile
    # b1_ref: (1, 128)   f32
    # w2_ref: (128, NC)  bf16
    # b2_ref: (1, NC)    f32
    # o_ref:  (B, NC)    f32    logits
    k = pl.program_id(0)

    @pl.when(k == 0)
    def _():
        acc_ref[...] = jnp.zeros_like(acc_ref)

    acc_ref[...] += jnp.dot(x_ref[...], w1_ref[...],
                            preferred_element_type=jnp.float32)

    @pl.when(k == pl.num_programs(0) - 1)
    def _():
        h = jnp.maximum(acc_ref[...] + b1_ref[...], 0.0)          # relu(fc1)
        o_ref[...] = jnp.dot(h.astype(w2_ref.dtype), w2_ref[...],
                             preferred_element_type=jnp.float32) + b2_ref[...]


# ------------------------------ wrappers ------------------------------------

def conv_pool_relu(xcol, w_packed, b_packed, rows, tm):
    # xcol: (4, rows_p, G*K) bf16 with rows_p % tm == 0; returns (rows, 128).
    _, rows_p, gk = xcol.shape
    assert rows_p % tm == 0
    out = pl.pallas_call(
        conv_pool_relu_kernel,
        out_shape=jax.ShapeDtypeStruct((rows_p, 128), jnp.bfloat16),
        grid_spec=pltpu.PrefetchScalarGridSpec(
            num_scalar_prefetch=0,
            grid=(rows_p // tm,),
            in_specs=[
                pl.BlockSpec((4, tm, gk), lambda m: (0, m, 0)),
                pl.BlockSpec((gk, 128), lambda m: (0, 0)),   # VMEM-resident
                pl.BlockSpec((1, 128), lambda m: (0, 0)),    # VMEM-resident
            ],
            out_specs=pl.BlockSpec((tm, 128), lambda m: (m, 0)),
        ),
        compiler_params=pltpu.CompilerParams(
            dimension_semantics=("parallel",),      # megacore shards M on v7x
            vmem_limit_bytes=_VMEM_LIMIT),
    )(xcol, w_packed, b_packed)
    return out[:rows]


def fc_head(flat, w1_eff, b1, w2, b2, tk):
    B, fp = flat.shape
    assert fp % tk == 0
    nc = w2.shape[1]
    return pl.pallas_call(
        fc_head_kernel,
        out_shape=jax.ShapeDtypeStruct((B, nc), jnp.float32),
        grid_spec=pltpu.PrefetchScalarGridSpec(
            num_scalar_prefetch=0,
            grid=(fp // tk,),
            in_specs=[
                pl.BlockSpec((B, tk), lambda k: (0, k)),
                pl.BlockSpec((tk, FC1_OUT), lambda k: (k, 0)),
                pl.BlockSpec((1, FC1_OUT), lambda k: (0, 0)),
                pl.BlockSpec((FC1_OUT, nc), lambda k: (0, 0)),
                pl.BlockSpec((1, nc), lambda k: (0, 0)),
            ],
            out_specs=pl.BlockSpec((B, nc), lambda k: (0, 0)),
            scratch_shapes=[pltpu.VMEM((B, FC1_OUT), jnp.float32)],
        ),
        compiler_params=pltpu.CompilerParams(
            dimension_semantics=("arbitrary",),     # K is a reduction axis
            vmem_limit_bytes=_VMEM_LIMIT),
    )(flat, w1_eff, b1, w2, b2)


# ------------------------------ glue ----------------------------------------

def im2col_pool_pack(feat, G):
    # (B, H, W, C) -> (4, B*(H//2)*((W//2)//G), G*9*C)
    # Feature order (dy, dx, ci) matches the conv weight row layout; rows are
    # pool-tap-major (tap = (a, b) of the 2x2 window) and G consecutive
    # pooled columns are packed per row (lane-dense output packing).
    B, H, W, C = feat.shape
    xp = jnp.pad(feat, ((0, 0), (1, 1), (1, 1), (0, 0)))   # torch padding=1
    cols = [xp[:, dy:dy + H, dx:dx + W, :] for dy in range(3) for dx in range(3)]
    xc = jnp.stack(cols, axis=3).reshape(B, H, W, 9 * C)
    Hh, Wh = H // 2, W // 2
    xc = xc.reshape(B, Hh, 2, Wh, 2, 9 * C)
    xc = jnp.transpose(xc, (2, 4, 0, 1, 3, 5))             # (2,2,B,Hh,Wh,9C)
    return xc.reshape(4, B * Hh * (Wh // G), G * 9 * C)


def _pick_rows_tile(rows):
    if rows >= _TM_TARGET:
        return _TM_TARGET, _round_up(rows, _TM_TARGET)
    rp = _round_up(rows, _SUBLANE)
    return rp, rp


def adaptive_avg_matrix(n_in, n_out):
    # Exact PyTorch AdaptiveAvgPool2d bin rule.
    A = np.zeros((n_out, n_in), np.float32)
    for i in range(n_out):
        s = (i * n_in) // n_out
        e = ((i + 1) * n_in + n_out - 1) // n_out
        A[i, s:e] = 1.0 / (e - s)
    return jnp.asarray(A)


def prepare_params(raw, H, W):
    """One-time weight prep.

    * Folds AdaptiveAvgPool2d(38,38) + NCHW flatten into fc1 (all linear, so
      exact), then casts the result to bf16 and pads its K dim to the fc tile.
    * Packs each conv weight into a block-diagonal (G*K, 128) bf16 matrix
      (G = 128//Cout pixels per lane-dense output row) and tiles the bias.
    """
    assert H % 8 == 0 and W % 8 == 0, "three 2x2 max-pools need H, W % 8 == 0"
    h3, w3 = H // 8, W // 8
    Ah = adaptive_avg_matrix(h3, ADAPT)                     # (38, h3)
    Aw = adaptive_avg_matrix(w3, ADAPT)                     # (38, w3)
    Wc = raw["fc1_w"].reshape(128, ADAPT, ADAPT, FC1_OUT)   # (c, i, j, m)
    w1_eff = jnp.einsum('ih,jw,cijm->hwcm', Ah, Aw, Wc)     # (h3, w3, c, m) f32
    w1_eff = w1_eff.reshape(h3 * w3 * 128, FC1_OUT)
    F = w1_eff.shape[0]
    tk = min(F, _FC_TK)
    Fp = _round_up(F, tk)
    if Fp != F:
        w1_eff = jnp.pad(w1_eff, ((0, Fp - F), (0, 0)))

    prepared = {
        "fc1_w_eff": w1_eff.astype(jnp.bfloat16),
        "fc1_b": raw["fc1_b"].reshape(1, -1).astype(jnp.float32),
        "fc2_w": raw["fc2_w"].astype(jnp.bfloat16),
        "fc2_b": raw["fc2_b"].reshape(1, -1).astype(jnp.float32),
    }
    for li, cout in _CONV_LAYERS:
        G = 128 // cout
        w = raw[f"conv{li}_w"]                              # (9*Cin, Cout) f32
        wp = jnp.kron(jnp.eye(G, dtype=w.dtype), w)         # (G*9*Cin, 128)
        prepared[f"conv{li}_wp"] = wp.astype(jnp.bfloat16)
        prepared[f"conv{li}_bp"] = jnp.tile(
            raw[f"conv{li}_b"], G).reshape(1, 128).astype(jnp.float32)
    return prepared


def cnn_phoneme_forward(x, params):
    # x: (B, H, W) float32 -- matches the torch input before x.unsqueeze(1)
    # params: output of prepare_params.
    B, H, W = x.shape
    feat = x[..., None].astype(jnp.bfloat16)                # NHWC, C=1
    # nn.Dropout(0.1): identity at inference time.
    # TODO(synk): conv1 (Cin=1) still goes through an XLA-side im2col matmul
    # (K=36 after lane packing); an in-kernel shifted-MAC conv1 / full
    # 3-layer fusion with halo blocks would remove the remaining im2col HBM
    # round trips between layers.
    h, w = H, W
    for li, cout in _CONV_LAYERS:
        G = 128 // cout
        hh, wh = h // 2, w // 2
        rows = B * hh * (wh // G)
        xcol = im2col_pool_pack(feat, G)                    # (4, rows, G*9*Cin)
        tm, rows_p = _pick_rows_tile(rows)
        if rows_p != rows:
            xcol = jnp.pad(xcol, ((0, 0), (0, rows_p - rows), (0, 0)))
        out = conv_pool_relu(xcol, params[f"conv{li}_wp"],
                             params[f"conv{li}_bp"], rows, tm)   # (rows, 128)
        # Undo the lane packing: row r covers G consecutive pooled columns.
        feat = out.reshape(B, hh, wh // G, G, cout).reshape(B, hh, wh, cout)
        h, w = hh, wh

    # NHWC flatten (h, w, c) matches W1_eff's row order exactly.
    flat = feat.reshape(B, h * w * 128)                     # (B, F) bf16
    Fp = params["fc1_w_eff"].shape[0]
    if Fp != flat.shape[1]:
        flat = jnp.pad(flat, ((0, 0), (0, Fp - flat.shape[1])))
    tk = min(Fp, _FC_TK)
    return fc_head(flat, params["fc1_w_eff"], params["fc1_b"],
                   params["fc2_w"], params["fc2_b"], tk)


def init_params(key):
    ks = jax.random.split(key, 10)

    def nrm(k, shape, scale):
        return jax.random.normal(k, shape, jnp.float32) * scale

    # Conv weights stored as (9*Cin, Cout); row (dy*3+dx)*Cin + ci corresponds
    # to torch conv weight[co, ci, dy, dx].  fc1_w is the full (184832, 128)
    # torch fc1 weight (transposed); it is folded once in prepare_params.
    return {
        "conv1_w": nrm(ks[0], (9 * 1, 32), 0.20),
        "conv1_b": nrm(ks[1], (32,), 0.02),
        "conv2_w": nrm(ks[2], (9 * 32, 64), 0.06),
        "conv2_b": nrm(ks[3], (64,), 0.02),
        "conv3_w": nrm(ks[4], (9 * 64, 128), 0.04),
        "conv3_b": nrm(ks[5], (128,), 0.02),
        "fc1_w":   nrm(ks[6], (FC1_IN, FC1_OUT), 0.002),
        "fc1_b":   nrm(ks[7], (FC1_OUT,), 0.02),
        "fc2_w":   nrm(ks[8], (FC1_OUT, NUM_CLASSES), 0.05),
        "fc2_b":   nrm(ks[9], (NUM_CLASSES,), 0.02),
    }


if __name__ == "__main__":
    root = jax.random.PRNGKey(0)
    k_par, k_in = jax.random.split(root)
    raw_params = init_params(k_par)
    x = jax.random.normal(k_in, (2, 16, 16), jnp.float32)    # (B, H, W)

    params = prepare_params(raw_params, 16, 16)              # one-time fold/pack
    fwd = jax.jit(cnn_phoneme_forward)
    logits = jax.block_until_ready(fwd(x, params))

    assert logits.shape == (2, NUM_CLASSES)
    assert bool(jnp.all(jnp.isfinite(logits)))
    print("KERNEL_OK")
</pallas_src>

<mosaic_0001>
module attributes {stable_mosaic.version = 11 : i64} {
  func.func @conv_pool_relu_kernel(%arg0: i32, %arg1: memref<4x32x36xbf16, #tpu.memory_space<vmem>>, %arg2: memref<36x128xbf16, #tpu.memory_space<vmem>>, %arg3: memref<1x128xf32, #tpu.memory_space<vmem>>, %arg4: memref<32x128xbf16, #tpu.memory_space<vmem>>) attributes {dimension_semantics = [#tpu.dimension_semantics<parallel>], iteration_bounds = array<i64: 1>, scalar_prefetch = 0 : i64, scratch_operands = 0 : i64, tpu.core_type = #tpu.core_type<tc>, window_params = [{transform_indices = @transform_0, window_bounds = array<i64: 4, 32, 36>}, {pipeline_mode = #tpu.pipeline_mode<synchronous>, transform_indices = @transform_1, window_bounds = array<i64: 36, 128>}, {pipeline_mode = #tpu.pipeline_mode<synchronous>, transform_indices = @transform_2, window_bounds = array<i64: 1, 128>}, {transform_indices = @transform_3, window_bounds = array<i64: 32, 128>}]} {
    %c0 = arith.constant 0 : index
    %c0_0 = arith.constant 0 : index
    %0 = vector.load %arg2[%c0, %c0_0] : memref<36x128xbf16, #tpu.memory_space<vmem>>, vector<36x128xbf16>
    %c0_1 = arith.constant 0 : index
    %c0_2 = arith.constant 0 : index
    %c0_3 = arith.constant 0 : index
    %1 = vector.load %arg1[%c0_1, %c0_2, %c0_3] : memref<4x32x36xbf16, #tpu.memory_space<vmem>>, vector<1x32x36xbf16>
    %2 = vector.shape_cast %1 : vector<1x32x36xbf16> to vector<32x36xbf16>
    %cst = arith.constant dense<0.000000e+00> : vector<32x128xf32>
    %3 = tpu.matmul %2, %0, %cst {dimension_numbers = #tpu.dot_dimension_numbers<[1], [0], [0], [1], [0, 0, 1, 1], [], []>} : vector<32x36xbf16>, vector<36x128xbf16>, vector<32x128xf32> -> vector<32x128xf32>
    %c1 = arith.constant 1 : index
    %c0_4 = arith.constant 0 : index
    %c0_5 = arith.constant 0 : index
    %4 = vector.load %arg1[%c1, %c0_4, %c0_5] : memref<4x32x36xbf16, #tpu.memory_space<vmem>>, vector<1x32x36xbf16>
    %5 = vector.shape_cast %4 : vector<1x32x36xbf16> to vector<32x36xbf16>
    %cst_6 = arith.constant dense<0.000000e+00> : vector<32x128xf32>
    %6 = tpu.matmul %5, %0, %cst_6 {dimension_numbers = #tpu.dot_dimension_numbers<[1], [0], [0], [1], [0, 0, 1, 1], [], []>} : vector<32x36xbf16>, vector<36x128xbf16>, vector<32x128xf32> -> vector<32x128xf32>
    %c2 = arith.constant 2 : index
    %c0_7 = arith.constant 0 : index
    %c0_8 = arith.constant 0 : index
    %7 = vector.load %arg1[%c2, %c0_7, %c0_8] : memref<4x32x36xbf16, #tpu.memory_space<vmem>>, vector<1x32x36xbf16>
    %8 = vector.shape_cast %7 : vector<1x32x36xbf16> to vector<32x36xbf16>
    %cst_9 = arith.constant dense<0.000000e+00> : vector<32x128xf32>
    %9 = tpu.matmul %8, %0, %cst_9 {dimension_numbers = #tpu.dot_dimension_numbers<[1], [0], [0], [1], [0, 0, 1, 1], [], []>} : vector<32x36xbf16>, vector<36x128xbf16>, vector<32x128xf32> -> vector<32x128xf32>
    %c3 = arith.constant 3 : index
    %c0_10 = arith.constant 0 : index
    %c0_11 = arith.constant 0 : index
    %10 = vector.load %arg1[%c3, %c0_10, %c0_11] : memref<4x32x36xbf16, #tpu.memory_space<vmem>>, vector<1x32x36xbf16>
    %11 = vector.shape_cast %10 : vector<1x32x36xbf16> to vector<32x36xbf16>
    %cst_12 = arith.constant dense<0.000000e+00> : vector<32x128xf32>
    %12 = tpu.matmul %11, %0, %cst_12 {dimension_numbers = #tpu.dot_dimension_numbers<[1], [0], [0], [1], [0, 0, 1, 1], [], []>} : vector<32x36xbf16>, vector<36x128xbf16>, vector<32x128xf32> -> vector<32x128xf32>
    %13 = arith.maximumf %3, %6 : vector<32x128xf32>
    %14 = arith.maximumf %9, %12 : vector<32x128xf32>
    %15 = arith.maximumf %13, %14 : vector<32x128xf32>
    %c0_13 = arith.constant 0 : index
    %c0_14 = arith.constant 0 : index
    %16 = vector.load %arg3[%c0_13, %c0_14] : memref<1x128xf32, #tpu.memory_space<vmem>>, vector<1x128xf32>
    %17 = vector.broadcast %16 : vector<1x128xf32> to vector<32x128xf32>
    %18 = arith.addf %15, %17 : vector<32x128xf32>
    %cst_15 = arith.constant 0.000000e+00 : f32
    %19 = vector.broadcast %cst_15 : f32 to vector<32x128xf32>
    %20 = arith.maximumf %18, %19 : vector<32x128xf32>
    %21 = arith.truncf %20 : vector<32x128xf32> to vector<32x128xbf16>
    %c0_16 = arith.constant 0 : index
    %c0_17 = arith.constant 0 : index
    %22 = vector.load %arg4[%c0_16, %c0_17] : memref<32x128xbf16, #tpu.memory_space<vmem>>, vector<32x128xbf16>
    tpu.vector_store %arg4[%c0_16, %c0_17], %21 {strides = array<i32>} : memref<32x128xbf16, #tpu.memory_space<vmem>>, vector<32x128xbf16>,
    return
  }
  func.func @transform_0(%arg0: i32) -> (i32, i32, i32) {
    %c0_i32 = arith.constant 0 : i32
    %c0_i32_0 = arith.constant 0 : i32
    %c0_i32_1 = arith.constant 0 : i32
    return %c0_i32, %arg0, %c0_i32_0 : i32, i32, i32
  }
  func.func @transform_1(%arg0: i32) -> (i32, i32) {
    %c0_i32 = arith.constant 0 : i32
    %c0_i32_0 = arith.constant 0 : i32
    %c0_i32_1 = arith.constant 0 : i32
    return %c0_i32, %c0_i32_0 : i32, i32
  }
  func.func @transform_2(%arg0: i32) -> (i32, i32) {
    %c0_i32 = arith.constant 0 : i32
    %c0_i32_0 = arith.constant 0 : i32
    %c0_i32_1 = arith.constant 0 : i32
    return %c0_i32, %c0_i32_0 : i32, i32
  }
  func.func @transform_3(%arg0: i32) -> (i32, i32) {
    %c0_i32 = arith.constant 0 : i32
    %c0_i32_0 = arith.constant 0 : i32
    return %arg0, %c0_i32 : i32, i32
  }
}

module attributes {stable_mosaic.version = 11 : i64} {
  func.func @conv_pool_relu_kernel(%arg0: i32, %arg1: memref<4x16x576xbf16, #tpu.memory_space<vmem>>, %arg2: memref<576x128xbf16, #tpu.memory_space<vmem>>, %arg3: memref<1x128xf32, #tpu.memory_space<vmem>>, %arg4: memref<16x128xbf16, #tpu.memory_space<vmem>>) attributes {dimension_semantics = [#tpu.dimension_semantics<parallel>], iteration_bounds = array<i64: 1>, scalar_prefetch = 0 : i64, scratch_operands = 0 : i64, tpu.core_type = #tpu.core_type<tc>, window_params = [{transform_indices = @transform_0, window_bounds = array<i64: 4, 16, 576>}, {pipeline_mode = #tpu.pipeline_mode<synchronous>, transform_indices = @transform_1, window_bounds = array<i64: 576, 128>}, {pipeline_mode = #tpu.pipeline_mode<synchronous>, transform_indices = @transform_2, window_bounds = array<i64: 1, 128>}, {transform_indices = @transform_3, window_bounds = array<i64: 16, 128>}]} {
    %c0 = arith.constant 0 : index
    %c0_0 = arith.constant 0 : index
    %0 = vector.load %arg2[%c0, %c0_0] : memref<576x128xbf16, #tpu.memory_space<vmem>>, vector<576x128xbf16>
    %c0_1 = arith.constant 0 : index
    %c0_2 = arith.constant 0 : index
    %c0_3 = arith.constant 0 : index
    %1 = vector.load %arg1[%c0_1, %c0_2, %c0_3] : memref<4x16x576xbf16, #tpu.memory_space<vmem>>, vector<1x16x576xbf16>
    %2 = vector.shape_cast %1 : vector<1x16x576xbf16> to vector<16x576xbf16>
    %cst = arith.constant dense<0.000000e+00> : vector<16x128xf32>
    %3 = tpu.matmul %2, %0, %cst {dimension_numbers = #tpu.dot_dimension_numbers<[1], [0], [0], [1], [0, 0, 1, 1], [], []>} : vector<16x576xbf16>, vector<576x128xbf16>, vector<16x128xf32> -> vector<16x128xf32>
    %c1 = arith.constant 1 : index
    %c0_4 = arith.constant 0 : index
    %c0_5 = arith.constant 0 : index
    %4 = vector.load %arg1[%c1, %c0_4, %c0_5] : memref<4x16x576xbf16, #tpu.memory_space<vmem>>, vector<1x16x576xbf16>
    %5 = vector.shape_cast %4 : vector<1x16x576xbf16> to vector<16x576xbf16>
    %cst_6 = arith.constant dense<0.000000e+00> : vector<16x128xf32>
    %6 = tpu.matmul %5, %0, %cst_6 {dimension_numbers = #tpu.dot_dimension_numbers<[1], [0], [0], [1], [0, 0, 1, 1], [], []>} : vector<16x576xbf16>, vector<576x128xbf16>, vector<16x128xf32> -> vector<16x128xf32>
    %c2 = arith.constant 2 : index
    %c0_7 = arith.constant 0 : index
    %c0_8 = arith.constant 0 : index
    %7 = vector.load %arg1[%c2, %c0_7, %c0_8] : memref<4x16x576xbf16, #tpu.memory_space<vmem>>, vector<1x16x576xbf16>
    %8 = vector.shape_cast %7 : vector<1x16x576xbf16> to vector<16x576xbf16>
    %cst_9 = arith.constant dense<0.000000e+00> : vector<16x128xf32>
    %9 = tpu.matmul %8, %0, %cst_9 {dimension_numbers = #tpu.dot_dimension_numbers<[1], [0], [0], [1], [0, 0, 1, 1], [], []>} : vector<16x576xbf16>, vector<576x128xbf16>, vector<16x128xf32> -> vector<16x128xf32>
    %c3 = arith.constant 3 : index
    %c0_10 = arith.constant 0 : index
    %c0_11 = arith.constant 0 : index
    %10 = vector.load %arg1[%c3, %c0_10, %c0_11] : memref<4x16x576xbf16, #tpu.memory_space<vmem>>, vector<1x16x576xbf16>
    %11 = vector.shape_cast %10 : vector<1x16x576xbf16> to vector<16x576xbf16>
    %cst_12 = arith.constant dense<0.000000e+00> : vector<16x128xf32>
    %12 = tpu.matmul %11, %0, %cst_12 {dimension_numbers = #tpu.dot_dimension_numbers<[1], [0], [0], [1], [0, 0, 1, 1], [], []>} : vector<16x576xbf16>, vector<576x128xbf16>, vector<16x128xf32> -> vector<16x128xf32>
    %13 = arith.maximumf %3, %6 : vector<16x128xf32>
    %14 = arith.maximumf %9, %12 : vector<16x128xf32>
    %15 = arith.maximumf %13, %14 : vector<16x128xf32>
    %c0_13 = arith.constant 0 : index
    %c0_14 = arith.constant 0 : index
    %16 = vector.load %arg3[%c0_13, %c0_14] : memref<1x128xf32, #tpu.memory_space<vmem>>, vector<1x128xf32>
    %17 = vector.broadcast %16 : vector<1x128xf32> to vector<16x128xf32>
    %18 = arith.addf %15, %17 : vector<16x128xf32>
    %cst_15 = arith.constant 0.000000e+00 : f32
    %19 = vector.broadcast %cst_15 : f32 to vector<16x128xf32>
    %20 = arith.maximumf %18, %19 : vector<16x128xf32>
    %21 = arith.truncf %20 : vector<16x128xf32> to vector<16x128xbf16>
    %c0_16 = arith.constant 0 : index
    %c0_17 = arith.constant 0 : index
    %22 = vector.load %arg4[%c0_16, %c0_17] : memref<16x128xbf16, #tpu.memory_space<vmem>>, vector<16x128xbf16>
    tpu.vector_store %arg4[%c0_16, %c0_17], %21 {strides = array<i32>} : memref<16x128xbf16, #tpu.memory_space<vmem>>, vector<16x128xbf16>,
    return
  }
  func.func @transform_0(%arg0: i32) -> (i32, i32, i32) {
    %c0_i32 = arith.constant 0 : i32
    %c0_i32_0 = arith.constant 0 : i32
    %c0_i32_1 = arith.constant 0 : i32
    return %c0_i32, %arg0, %c0_i32_0 : i32, i32, i32
  }
  func.func @transform_1(%arg0: i32) -> (i32, i32) {
    %c0_i32 = arith.constant 0 : i32
    %c0_i32_0 = arith.constant 0 : i32
    %c0_i32_1 = arith.constant 0 : i32
    return %c0_i32, %c0_i32_0 : i32, i32
  }
  func.func @transform_2(%arg0: i32) -> (i32, i32) {
    %c0_i32 = arith.constant 0 : i32
    %c0_i32_0 = arith.constant 0 : i32
    %c0_i32_1 = arith.constant 0 : i32
    return %c0_i32, %c0_i32_0 : i32, i32
  }
  func.func @transform_3(%arg0: i32) -> (i32, i32) {
    %c0_i32 = arith.constant 0 : i32
    %c0_i32_0 = arith.constant 0 : i32
    return %arg0, %c0_i32 : i32, i32
  }
}

module attributes {stable_mosaic.version = 11 : i64} {
  func.func @fc_head_kernel(%arg0: i32, %arg1: memref<2x512xbf16, #tpu.memory_space<vmem>>, %arg2: memref<512x128xbf16, #tpu.memory_space<vmem>>, %arg3: memref<1x128xf32, #tpu.memory_space<vmem>>, %arg4: memref<128x39xbf16, #tpu.memory_space<vmem>>, %arg5: memref<1x39xf32, #tpu.memory_space<vmem>>, %arg6: memref<2x39xf32, #tpu.memory_space<vmem>>, %arg7: memref<2x128xf32, #tpu.memory_space<vmem>>) attributes {dimension_semantics = [#tpu.dimension_semantics<arbitrary>], iteration_bounds = array<i64: 1>, scalar_prefetch = 0 : i64, scratch_operands = 1 : i64, tpu.core_type = #tpu.core_type<tc>, window_params = [{transform_indices = @transform_0, window_bounds = array<i64: 2, 512>}, {transform_indices = @transform_1, window_bounds = array<i64: 512, 128>}, {pipeline_mode = #tpu.pipeline_mode<synchronous>, transform_indices = @transform_2, window_bounds = array<i64: 1, 128>}, {pipeline_mode = #tpu.pipeline_mode<synchronous>, transform_indices = @transform_3, window_bounds = array<i64: 128, 39>}, {pipeline_mode = #tpu.pipeline_mode<synchronous>, transform_indices = @transform_4, window_bounds = array<i64: 1, 39>}, {pipeline_mode = #tpu.pipeline_mode<synchronous>, transform_indices = @transform_5, window_bounds = array<i64: 2, 39>}]} {
    %c0_i32 = arith.constant 0 : i32
    %0 = arith.cmpi eq, %arg0, %c0_i32 : i32
    %1 = arith.extui %0 : i1 to i32
    %c0_i32_0 = arith.constant 0 : i32
    %2 = arith.cmpi ne, %1, %c0_i32_0 : i32
    scf.if %2 {
      %cst_10 = arith.constant 0.000000e+00 : f32
      %12 = vector.broadcast %cst_10 : f32 to vector<2x128xf32>
      %c0_11 = arith.constant 0 : index
      %c0_12 = arith.constant 0 : index
      %13 = vector.load %arg7[%c0_11, %c0_12] : memref<2x128xf32, #tpu.memory_space<vmem>>, vector<2x128xf32>
      tpu.vector_store %arg7[%c0_11, %c0_12], %12 {strides = array<i32>} : memref<2x128xf32, #tpu.memory_space<vmem>>, vector<2x128xf32>,
    } else {
    }
    %c0 = arith.constant 0 : index
    %c0_1 = arith.constant 0 : index
    %3 = vector.load %arg7[%c0, %c0_1] : memref<2x128xf32, #tpu.memory_space<vmem>>, vector<2x128xf32>
    %c0_2 = arith.constant 0 : index
    %c0_3 = arith.constant 0 : index
    %4 = vector.load %arg1[%c0_2, %c0_3] : memref<2x512xbf16, #tpu.memory_space<vmem>>, vector<2x512xbf16>
    %c0_4 = arith.constant 0 : index
    %c0_5 = arith.constant 0 : index
    %5 = vector.load %arg2[%c0_4, %c0_5] : memref<512x128xbf16, #tpu.memory_space<vmem>>, vector<512x128xbf16>
    %cst = arith.constant dense<0.000000e+00> : vector<2x128xf32>
    %6 = tpu.matmul %4, %5, %cst {dimension_numbers = #tpu.dot_dimension_numbers<[1], [0], [0], [1], [0, 0, 1, 1], [], []>} : vector<2x512xbf16>, vector<512x128xbf16>, vector<2x128xf32> -> vector<2x128xf32>
    %7 = arith.addf %3, %6 : vector<2x128xf32>
    %c0_6 = arith.constant 0 : index
    %c0_7 = arith.constant 0 : index
    %8 = vector.load %arg7[%c0_6, %c0_7] : memref<2x128xf32, #tpu.memory_space<vmem>>, vector<2x128xf32>
    tpu.vector_store %arg7[%c0_6, %c0_7], %7 {strides = array<i32>} : memref<2x128xf32, #tpu.memory_space<vmem>>, vector<2x128xf32>,
    %c0_i32_8 = arith.constant 0 : i32
    %9 = arith.cmpi eq, %arg0, %c0_i32_8 : i32
    %10 = arith.extui %9 : i1 to i32
    %c0_i32_9 = arith.constant 0 : i32
    %11 = arith.cmpi ne, %10, %c0_i32_9 : i32
    scf.if %11 {
      %c0_10 = arith.constant 0 : index
      %c0_11 = arith.constant 0 : index
      %12 = vector.load %arg7[%c0_10, %c0_11] : memref<2x128xf32, #tpu.memory_space<vmem>>, vector<2x128xf32>
      %c0_12 = arith.constant 0 : index
      %c0_13 = arith.constant 0 : index
      %13 = vector.load %arg3[%c0_12, %c0_13] : memref<1x128xf32, #tpu.memory_space<vmem>>, vector<1x128xf32>
      %14 = vector.broadcast %13 : vector<1x128xf32> to vector<2x128xf32>
      %15 = arith.addf %12, %14 : vector<2x128xf32>
      %cst_14 = arith.constant 0.000000e+00 : f32
      %16 = vector.broadcast %cst_14 : f32 to vector<2x128xf32>
      %17 = arith.maximumf %15, %16 : vector<2x128xf32>
      %18 = arith.truncf %17 : vector<2x128xf32> to vector<2x128xbf16>
      %c0_15 = arith.constant 0 : index
      %c0_16 = arith.constant 0 : index
      %19 = vector.load %arg4[%c0_15, %c0_16] : memref<128x39xbf16, #tpu.memory_space<vmem>>, vector<128x39xbf16>
      %cst_17 = arith.constant dense<0.000000e+00> : vector<2x39xf32>
      %20 = tpu.matmul %18, %19, %cst_17 {dimension_numbers = #tpu.dot_dimension_numbers<[1], [0], [0], [1], [0, 0, 1, 1], [], []>} : vector<2x128xbf16>, vector<128x39xbf16>, vector<2x39xf32> -> vector<2x39xf32>
      %c0_18 = arith.constant 0 : index
      %c0_19 = arith.constant 0 : index
      %21 = vector.load %arg5[%c0_18, %c0_19] : memref<1x39xf32, #tpu.memory_space<vmem>>, vector<1x39xf32>
      %22 = vector.broadcast %21 : vector<1x39xf32> to vector<2x39xf32>
      %23 = arith.addf %20, %22 : vector<2x39xf32>
      %c0_20 = arith.constant 0 : index
      %c0_21 = arith.constant 0 : index
      %24 = vector.load %arg6[%c0_20, %c0_21] : memref<2x39xf32, #tpu.memory_space<vmem>>, vector<2x39xf32>
      tpu.vector_store %arg6[%c0_20, %c0_21], %23 {strides = array<i32>} : memref<2x39xf32, #tpu.memory_space<vmem>>, vector<2x39xf32>,
    } else {
    }
    return
  }
  func.func @transform_0(%arg0: i32) -> (i32, i32) {
    %c0_i32 = arith.constant 0 : i32
    %c0_i32_0 = arith.constant 0 : i32
    return %c0_i32, %arg0 : i32, i32
  }
  func.func @transform_1(%arg0: i32) -> (i32, i32) {
    %c0_i32 = arith.constant 0 : i32
    %c0_i32_0 = arith.constant 0 : i32
    return %arg0, %c0_i32 : i32, i32
  }
  func.func @transform_2(%arg0: i32) -> (i32, i32) {
    %c0_i32 = arith.constant 0 : i32
    %c0_i32_0 = arith.constant 0 : i32
    %c0_i32_1 = arith.constant 0 : i32
    return %c0_i32, %c0_i32_0 : i32, i32
  }
  func.func @transform_3(%arg0: i32) -> (i32, i32) {
    %c0_i32 = arith.constant 0 : i32
    %c0_i32_0 = arith.constant 0 : i32
    %c0_i32_1 = arith.constant 0 : i32
    return %c0_i32, %c0_i32_0 : i32, i32
  }
  func.func @transform_4(%arg0: i32) -> (i32, i32) {
    %c0_i32 = arith.constant 0 : i32
    %c0_i32_0 = arith.constant 0 : i32
    %c0_i32_1 = arith.constant 0 : i32
    return %c0_i32, %c0_i32_0 : i32, i32
  }
  func.func @transform_5(%arg0: i32) -> (i32, i32) {
    %c0_i32 = arith.constant 0 : i32
    %c0_i32_0 = arith.constant 0 : i32
    %c0_i32_1 = arith.constant 0 : i32
    return %c0_i32, %c0_i32_0 : i32, i32
  }
}

</mosaic_0001>

<bundles_post_ra>
// kernel: cnn_phoneme_forward.4
= control target key start
LH: loop header
LB: loop body
LE: loop exit
PB: predicated region body
PF: predicated region fallthrough
CT: control target
= control target key end

     0   :  { %vm49_vm0 = vcmask 293888   ;;  %vm56_vm1 = vcmask 1041408   ;;  %s571_s1 = inlined_call_operand.vmem [shape: bf16[36,128], index: 1, kind: input, shape index: {}]   ;;  %s572_s0 = inlined_call_operand.vmem [shape: bf16[4,32,36], index: 0, kind: input, shape index: {}]   ;;  %s573_s2 = inlined_call_operand.vmem [shape: f32[1,128], index: 2, kind: input, shape index: {}]   ;;  %s574_s3 = inlined_call_operand.vmem [shape: bf16[32,128], index: 3, kind: output, shape index: {}]  }
   0x1   :  { %v485_v0 = vld [vmem:[%s571_s1] sm:$0xff]   ;;  %v486_v1 = vld [vmem:[%s571_s1 + $0x8] sm:$0xff]   ;;  %v487_v2 = vld [vmem:[%s571_s1 + $0x10] ss:$0 sps:$4 sm:$0x33]  }
   0x2   :  { %441 = vmatprep.subr.bf16.mxu0 %v485_v0  ;;  %451 = vmatprep.subr.bf16.mxu1 %v485_v0  ;;  %v488_v3 = vld [vmem:[%s572_s0] sm:$0xff]   ;;  %v489_v4 = vld [vmem:[%s572_s0 + $0x10] sm:$0xff]   ;;  %v58_v5 = vsel %vm56_vm1, %v487_v2, 0  ;;  %v490_v6 = vld [vmem:[%s572_s0 + $0x8] sm:$0xff]  }
   0x3   :  { %442 = vmatpush3.bf16.msra.mxu0 %v485_v0  ;;  %452 = vmatpush3.bf16.msra.mxu1 %v485_v0  ;;  %v491_v7 = vld [vmem:[%s572_s0 + $0x18] sm:$0xff]   ;;  %v492_v8 = vld [vmem:[%s572_s0 + $0x20] sm:$0xff]   ;;  %v493_v9 = vld [vmem:[%s572_s0 + $0x30] sm:$0xff]  }
   0x4   :  { %443 = vmatprep.subr.bf16.mxu0 %v486_v1  ;;  %453 = vmatprep.subr.bf16.mxu1 %v486_v1  ;;  %v494_v10 = vld [vmem:[%s572_s0 + $0x28] sm:$0xff]   ;;  %v495_v11 = vld [vmem:[%s572_s0 + $0x38] sm:$0xff]   ;;  %v401_v29 = vld [vmem:[%s573_s2] ss:$0 sm:$0xff] }
   0x5   :  { %447 = vmatprep.mubr.msk.bf16.mxu0 %vm49_vm0, %v488_v3  ;;  %457 = vmatprep.mubr.msk.bf16.mxu1 %vm49_vm0, %v489_v4 }
   0x7   :  { %444 = vmatpush3.bf16.msra.mxu0 %v486_v1  ;;  %454 = vmatpush3.bf16.msra.mxu1 %v486_v1 }
   0x8   :  { %481 = vmatprep.subr.msk.bf16.mxu0 %vm56_vm1, %v487_v2  ;;  %482 = vmatprep.subr.msk.bf16.mxu1 %vm56_vm1, %v487_v2 }
   0xb   :  { %446 = vmatpush3.bf16.msra.mxu0 %v58_v5  ;;  %456 = vmatpush3.bf16.msra.mxu1 %v58_v5 }
   0xc   :  { %461 = vmatprep.subr.bf16.mxu0 %v485_v0  ;;  %471 = vmatprep.subr.bf16.mxu1 %v485_v0 }
   0xe   :  { %448 = vmatmul.mubr.msk.bf16.vlgmr.msra.gmra.mrb[0].mxu0 %vm49_vm0, %v490_v6  ;;  %458 = vmatmul.mubr.msk.bf16.vlgmr.msra.gmra.mrb[0].mxu1 %vm49_vm0, %v491_v7 }
   0xf   :  { %462 = vmatpush3.bf16.msra.mxu0 %v485_v0  ;;  %472 = vmatpush3.bf16.msra.mxu1 %v485_v0 }
  0x10   :  { %463 = vmatprep.subr.bf16.mxu0 %v486_v1  ;;  %473 = vmatprep.subr.bf16.mxu1 %v486_v1 }
  0x11   :  { %467 = vmatprep.mubr.msk.bf16.mxu0 %vm49_vm0, %v492_v8  ;;  %477 = vmatprep.mubr.msk.bf16.mxu1 %vm49_vm0, %v493_v9 }
  0x13   :  { %464 = vmatpush3.bf16.msra.mxu0 %v486_v1  ;;  %474 = vmatpush3.bf16.msra.mxu1 %v486_v1 }
  0x14   :  { %483 = vmatprep.subr.msk.bf16.mxu0 %vm56_vm1, %v487_v2  ;;  %484 = vmatprep.subr.msk.bf16.mxu1 %vm56_vm1, %v487_v2 }
  0x17   :  { %466 = vmatpush3.bf16.msra.mxu0 %v58_v5  ;;  %476 = vmatpush3.bf16.msra.mxu1 %v58_v5 }
  0x1a   :  { %468 = vmatmul.mubr.msk.bf16.vlgmr.msra.gmra.mrb[4].mxu0 %vm49_vm0, %v494_v10  ;;  %478 = vmatmul.mubr.msk.bf16.vlgmr.msra.gmra.mrb[4].mxu1 %vm49_vm0, %v495_v11 }
  0xe1   :  { %v449_v12 = vpop.f32.mrb[0].mxu0  ;;  %v459_v13 = vpop.f32.mrb[0].mxu1 }
  0xe2   :  { %v321_v14 = vmax.f32 %v449_v12, %v459_v13  ;;  %v94_v15 = vpop.f32.mrb[1].mxu0  ;;  %v164_v16 = vpop.f32.mrb[1].mxu1 }
  0xe3   :  { %v319_v17 = vmax.f32 %v94_v15, %v164_v16  ;;  %v450_v18 = vpop.f32.mrb[2].mxu0  ;;  %v460_v19 = vpop.f32.mrb[2].mxu1 }
  0xe4   :  { %v322_v20 = vmax.f32 %v450_v18, %v460_v19  ;;  %v97_v21 = vpop.f32.mrb[3].mxu0  ;;  %v167_v22 = vpop.f32.mrb[3].mxu1 }
  0xe5   :  { %v320_v23 = vmax.f32 %v97_v21, %v167_v22 }
  0xed   :  { %v469_v24 = vpop.f32.mrb[4].mxu0  ;;  %v479_v25 = vpop.f32.mrb[4].mxu1 }
  0xee   :  { %v325_v26 = vmax.f32 %v469_v24, %v479_v25  ;;  %v234_v27 = vpop.f32.mrb[5].mxu0  ;;  %v304_v28 = vpop.f32.mrb[5].mxu1 }
  0xef   :  { %v323_v30 = vmax.f32 %v234_v27, %v304_v28  ;;  %v470_v31 = vpop.f32.mrb[6].mxu0  ;;  %v480_v32 = vpop.f32.mrb[6].mxu1 }
  0xf0   :  { %v329_v33 = vmax.f32 %v321_v14, %v325_v26  ;;  %v326_v34 = vmax.f32 %v470_v31, %v480_v32  ;;  %v237_v35 = vpop.f32.mrb[7].mxu0  ;;  %v307_v36 = vpop.f32.mrb[7].mxu1 }
  0xf1   :  { %v327_v37 = vmax.f32 %v319_v17, %v323_v30  ;;  %v324_v38 = vmax.f32 %v237_v35, %v307_v36 }
  0xf2   :  { %v340_v39 = vadd.f32 %v401_v29, %v329_v33  ;;  %v330_v40 = vmax.f32 %v322_v20, %v326_v34 }
  0xf3   :  { %v338_v41 = vadd.f32 %v401_v29, %v327_v37  ;;  %v328_v42 = vmax.f32 %v320_v23, %v324_v38 }
  0xf4   :  { %v341_v43 = vadd.f32 %v401_v29, %v330_v40  ;;  %v344_v45 = vmax.f32 %v340_v39, 0.0 }
  0xf5   :  { %v339_v44 = vadd.f32 %v401_v29, %v328_v42  ;;  %v342_v47 = vmax.f32 %v338_v41, 0.0 }
  0xf6   :  { %v345_v46 = vmax.f32 %v341_v43, 0.0 }
  0xf7   :  { %v343_v48 = vmax.f32 %v339_v44, 0.0 }
  0xf8   :  { %v418_v49 = vpack.c.bf16 %v345_v46, %v344_v45 }
  0xf9   :  { %v413_v50 = vpack.c.bf16 %v343_v48, %v342_v47 }
  0xfa   :  { %420 = vst [vmem:[%s574_s3 + $0x8] sm:$0xff] %v418_v49  }
  0xfb   :  { %414 = vst [vmem:[%s574_s3] sm:$0xff] %v413_v50  }

// kernel: cnn_phoneme_forward.5
= control target key start
LH: loop header
LB: loop body
LE: loop exit
PB: predicated region body
PF: predicated region fallthrough
CT: control target
= control target key end

     0   :  { %v1364_v34 = vmov 0.0   ;;  %vm1365_vm0 = vmmov 0   ;;  %vm334_vm1 = vcmask 523264   ;;  %s1810_s1 = inlined_call_operand.vmem [shape: bf16[576,128], index: 1, kind: input, shape index: {}]   ;;  %s1811_s0 = inlined_call_operand.vmem [shape: bf16[4,16,576], index: 0, kind: input, shape index: {}]   ;;  %s1812_s2 = inlined_call_operand.vmem [shape: f32[1,128], index: 2, kind: input, shape index: {}]   ;;  %s1813_s3 = inlined_call_operand.vmem [shape: bf16[16,128], index: 3, kind: output, shape index: {}]  }
   0x1   :  { %v1389_v0 = vld [vmem:[%s1810_s1 + $0x40] sm:$0xff]   ;;  %v1412_v4 = vld [vmem:[%s1810_s1 + $0x48] sm:$0xff]   ;;  %v1436_v8 = vld [vmem:[%s1810_s1 + $0x50] sm:$0xff]  }
   0x2   :  { %v1394_v1 = vld [vmem:[%s1810_s1 + $0xc0] sm:$0xff]   ;;  %1054 = vmatprep.subr.bf16.mxu0 %v1389_v0  ;;  %v1418_v5 = vld [vmem:[%s1810_s1 + $0xc8] sm:$0xff]   ;;  %v1442_v9 = vld [vmem:[%s1810_s1 + $0xd0] sm:$0xff]  }
   0x3   :  { %v1400_v2 = vld [vmem:[%s1810_s1] sm:$0xff]   ;;  %1076 = vmatprep.subr.bf16.mxu1 %v1394_v1  ;;  %v1424_v6 = vld [vmem:[%s1810_s1 + $0x8] sm:$0xff]   ;;  %v1448_v10 = vld [vmem:[%s1810_s1 + $0x10] sm:$0xff]  }
   0x4   :  { %v1406_v3 = vld [vmem:[%s1810_s1 + $0x80] sm:$0xff]   ;;  %1055 = vmatpush3.bf16.msra.mxu0 %v1400_v2  ;;  %v1430_v7 = vld [vmem:[%s1810_s1 + $0x88] sm:$0xff]   ;;  %v1454_v11 = vld [vmem:[%s1810_s1 + $0x90] sm:$0xff]  }
   0x5   :  { %1077 = vmatpush3.bf16.msra.mxu1 %v1406_v3  ;;  %1056 = vmatprep.subr.bf16.mxu0 %v1412_v4  ;;  %v1460_v12 = vld [vmem:[%s1810_s1 + $0x58] sm:$0xff]   ;;  %v1484_v16 = vld [vmem:[%s1810_s1 + $0x60] sm:$0xff]   ;;  %v1508_v20 = vld [vmem:[%s1810_s1 + $0x68] sm:$0xff]  }
   0x6   :  { %1078 = vmatprep.subr.bf16.mxu1 %v1418_v5  ;;  %v1466_v13 = vld [vmem:[%s1810_s1 + $0xd8] sm:$0xff]   ;;  %v1490_v17 = vld [vmem:[%s1810_s1 + $0xe0] sm:$0xff]   ;;  %v1514_v21 = vld [vmem:[%s1810_s1 + $0xe8] sm:$0xff]  }
   0x7   :  { %v1472_v14 = vld [vmem:[%s1810_s1 + $0x18] sm:$0xff]   ;;  %v1496_v18 = vld [vmem:[%s1810_s1 + $0x20] sm:$0xff]   ;;  %v1520_v22 = vld [vmem:[%s1810_s1 + $0x28] sm:$0xff]  }
   0x8   :  { %1057 = vmatpush3.bf16.msra.mxu0 %v1424_v6  ;;  %v1478_v15 = vld [vmem:[%s1810_s1 + $0x98] sm:$0xff]   ;;  %v1502_v19 = vld [vmem:[%s1810_s1 + $0xa0] sm:$0xff]   ;;  %v1526_v23 = vld [vmem:[%s1810_s1 + $0xa8] sm:$0xff]  }
   0x9   :  { %1079 = vmatpush3.bf16.msra.mxu1 %v1430_v7  ;;  %1058 = vmatprep.subr.bf16.mxu0 %v1436_v8  ;;  %v1532_v24 = vld [vmem:[%s1810_s1 + $0x70] sm:$0xff]   ;;  %v1556_v28 = vld [vmem:[%s1810_s1 + $0x78] sm:$0xff]   ;;  %v1337_v36 = vld [vmem:[%s1811_s0 + $0xc] ss:$20 sps:$4 sm:$0xff]  }
   0xa   :  { %1080 = vmatprep.subr.bf16.mxu1 %v1442_v9  ;;  %v1538_v25 = vld [vmem:[%s1810_s1 + $0xf0] sm:$0xff]   ;;  %v1562_v29 = vld [vmem:[%s1810_s1 + $0xf8] sm:$0xff]   ;;  %v1595_v37 = vld [vmem:[%s1810_s1 + $0x100] sm:$0xff]   ;;  %411 = vmatprep.mubr.bf16.mxu1 %v1337_v36 }
   0xb   :  { %v1544_v26 = vld [vmem:[%s1810_s1 + $0x30] sm:$0xff]   ;;  %v1568_v30 = vld [vmem:[%s1810_s1 + $0x38] sm:$0xff]   ;;  %v1601_v38 = vld [vmem:[%s1810_s1 + $0x108] sm:$0xff]  }
   0xc   :  { %1059 = vmatpush3.bf16.msra.mxu0 %v1448_v10  ;;  %v1550_v27 = vld [vmem:[%s1810_s1 + $0xb0] sm:$0xff]   ;;  %v1574_v31 = vld [vmem:[%s1810_s1 + $0xb8] sm:$0xff]   ;;  %v1345_v39 = vld [vmem:[%s1811_s0 + $0x2c] ss:$20 sps:$4 sm:$0xff]  }
   0xd   :  { %1081 = vmatpush3.bf16.msra.mxu1 %v1454_v11  ;;  %1060 = vmatprep.subr.bf16.mxu0 %v1460_v12  ;;  %v1332_v32 = vld [vmem:[%s1811_s0] ss:$20 sps:$4 sm:$0xff]   ;;  %v1334_v33 = vld [vmem:[%s1811_s0 + $0x4] ss:$20 sps:$4 sm:$0xff]   ;;  %v1335_v35 = vld [vmem:[%s1811_s0 + $0x8] ss:$20 sps:$4 sm:$0xff]  }
   0xe   :  { %1082 = vmatprep.subr.bf16.mxu1 %v1466_v13  ;;  %370 = vmatprep.mubr.bf16.mxu0 %v1334_v33  ;;  %v1615_v40 = vld [vmem:[%s1810_s1 + $0x110] sm:$0xff]   ;;  %v1624_v41 = vld [vmem:[%s1810_s1 + $0x118] sm:$0xff]  }
   0xf   :  { %v1342_v42 = vld [vmem:[%s1811_s0 + $0x10] ss:$20 sps:$4 sm:$0xff]   ;;  %v1348_v43 = vld [vmem:[%s1811_s0 + $0x34] ss:$20 sps:$4 sm:$0xff]   ;;  %v1349_v46 = vld [vmem:[%s1811_s0 + $0x38] ss:$20 sps:$4 sm:$0xff]  }
  0x10   :  { %1061 = vmatpush3.bf16.msra.mxu0 %v1472_v14  ;;  %v1343_v44 = vld [vmem:[%s1811_s0 + $0x28] ss:$20 sps:$4 sm:$0xff]   ;;  %v1346_v45 = vld [vmem:[%s1811_s0 + $0x30] ss:$20 sps:$4 sm:$0xff]   ;;  %v1353_v50 = vld [vmem:[%s1811_s0 + $0x58] ss:$20 sps:$4 sm:$0xff]  }
  0x11   :  { %1083 = vmatpush3.bf16.msra.mxu1 %v1478_v15  ;;  %1062 = vmatprep.subr.bf16.mxu0 %v1484_v16  ;;  %v1352_v47 = vld [vmem:[%s1811_s0 + $0x54] ss:$20 sps:$4 sm:$0xff]   ;;  %v1355_v48 = vld [vmem:[%s1811_s0 + $0x5c] ss:$20 sps:$4 sm:$0xff]   ;;  %v1362_v53 = vld [vmem:[%s1811_s0 + $0x84] ss:$20 sps:$4 sm:$0xff]  }
  0x12   :  { %1084 = vmatprep.subr.bf16.mxu1 %v1490_v17  ;;  %v1350_v49 = vld [vmem:[%s1811_s0 + $0x50] ss:$20 sps:$4 sm:$0xff]   ;;  %v1356_v52 = vld [vmem:[%s1811_s0 + $0x60] ss:$20 sps:$4 sm:$0xff]   ;;  %v1357_v54 = vld [vmem:[%s1811_s0 + $0x78] ss:$20 sps:$4 sm:$0xff]  }
  0x13   :  { %v1359_v51 = vld [vmem:[%s1811_s0 + $0x7c] ss:$20 sps:$4 sm:$0xff]   ;;  %v1360_v55 = vld [vmem:[%s1811_s0 + $0x80] ss:$20 sps:$4 sm:$0xff]  }
  0x14   :  { %1063 = vmatpush3.bf16.msra.mxu0 %v1496_v18  ;;  %v1363_v56 = vld [vmem:[%s1811_s0 + $0x88] ss:$20 sps:$4 sm:$0xff]  }
  0x15   :  { %1085 = vmatpush3.bf16.msra.mxu1 %v1502_v19  ;;  %1064 = vmatprep.subr.bf16.mxu0 %v1508_v20 }
  0x16   :  { %1086 = vmatprep.subr.bf16.mxu1 %v1514_v21 }
  0x18   :  { %1065 = vmatpush3.bf16.msra.mxu0 %v1520_v22 }
  0x19   :  { %1087 = vmatpush3.bf16.msra.mxu1 %v1526_v23  ;;  %1066 = vmatprep.subr.bf16.mxu0 %v1532_v24 }
  0x1a   :  { %1088 = vmatprep.subr.bf16.mxu1 %v1538_v25 }
  0x1c   :  { %1067 = vmatpush3.bf16.msra.mxu0 %v1544_v26 }
  0x1d   :  { %1089 = vmatpush3.bf16.msra.mxu1 %v1550_v27  ;;  %1068 = vmatprep.subr.bf16.mxu0 %v1556_v28 }
  0x1e   :  { %1090 = vmatprep.subr.bf16.mxu1 %v1562_v29 }
  0x20   :  { %1069 = vmatpush3.bf16.msra.mxu0 %v1568_v30 }
  0x21   :  { %1091 = vmatpush3.bf16.msra.mxu1 %v1574_v31  ;;  %1250 = vmatprep.subr.bf16.mxu0 %v1364_v34 }
  0x22   :  { %1103 = vmatprep.subr.bf16.mxu1 %v1389_v0 }
  0x23   :  { %371 = vmatmul.mubr.bf16.vlgmr.msra.gmra.mrb[0].mxu0 %v1332_v32 }
  0x24   :  { %412 = vmatmul.mubr.bf16.vlgmr.msra.gmra.mrb[0].mxu1 %v1335_v35  ;;  %1251 = vmatpush3.bf16.msra.mxu0 %v1595_v37 }
  0x25   :  { %1104 = vmatpush3.bf16.msra.mxu1 %v1400_v2  ;;  %1252 = vmatprep.subr.bf16.mxu0 %v1364_v34 }
  0x26   :  { %1105 = vmatprep.subr.bf16.mxu1 %v1412_v4  ;;  %1258 = vmatprep.mubr.msk.bf16.mxu0 %vm1365_vm0, %v1364_v34 }
  0x27   :  { %528 = vmatprep.mubr.bf16.mxu1 %v1345_v39 }
  0x28   :  { %1253 = vmatpush3.bf16.msra.mxu0 %v1601_v38 }
  0x29   :  { %1106 = vmatpush3.bf16.msra.mxu1 %v1424_v6  ;;  %1254 = vmatprep.subr.bf16.mxu0 %v1364_v34 }
  0x2a   :  { %1107 = vmatprep.subr.bf16.mxu1 %v1436_v8 }
  0x2c   :  { %1255 = vmatpush3.bf16.msra.mxu0 %v1615_v40 }
  0x2d   :  { %1108 = vmatpush3.bf16.msra.mxu1 %v1448_v10  ;;  %1256 = vmatprep.subr.bf16.mxu0 %v1364_v34 }
  0x2e   :  { %1109 = vmatprep.subr.bf16.mxu1 %v1460_v12 }
  0x30   :  { %1257 = vmatpush3.bf16.msra.mxu0 %v1624_v41 }
  0x31   :  { %1110 = vmatpush3.bf16.msra.mxu1 %v1472_v14  ;;  %1125 = vmatprep.subr.bf16.mxu0 %v1394_v1 }
  0x32   :  { %1111 = vmatprep.subr.bf16.mxu1 %v1484_v16 }
  0x33   :  { %1259 = vmatmul.mubr.msk.bf16.vlgmr.msra.gmra.mrb[4].mxu0 %vm334_vm1, %v1342_v42 }
  0x34   :  { %1126 = vmatpush3.bf16.msra.mxu0 %v1406_v3  ;;  %569 = vmatprep.mubr.bf16.mxu0 %v1348_v43 }
  0x35   :  { %1112 = vmatpush3.bf16.msra.mxu1 %v1496_v18  ;;  %1127 = vmatprep.subr.bf16.mxu0 %v1418_v5 }
  0x36   :  { %1113 = vmatprep.subr.bf16.mxu1 %v1508_v20 }
  0x38   :  { %1128 = vmatpush3.bf16.msra.mxu0 %v1430_v7 }
  0x39   :  { %1114 = vmatpush3.bf16.msra.mxu1 %v1520_v22  ;;  %1129 = vmatprep.subr.bf16.mxu0 %v1442_v9 }
  0x3a   :  { %1115 = vmatprep.subr.bf16.mxu1 %v1532_v24 }
  0x3c   :  { %1130 = vmatpush3.bf16.msra.mxu0 %v1454_v11 }
  0x3d   :  { %1116 = vmatpush3.bf16.msra.mxu1 %v1544_v26  ;;  %1131 = vmatprep.subr.bf16.mxu0 %v1466_v13 }
  0x3e   :  { %1117 = vmatprep.subr.bf16.mxu1 %v1556_v28 }
  0x40   :  { %1132 = vmatpush3.bf16.msra.mxu0 %v1478_v15 }
  0x41   :  { %1118 = vmatpush3.bf16.msra.mxu1 %v1568_v30  ;;  %1133 = vmatprep.subr.bf16.mxu0 %v1490_v17 }
  0x42   :  { %1262 = vmatprep.subr.bf16.mxu1 %v1364_v34 }
  0x44   :  { %529 = vmatmul.mubr.bf16.vlgmr.msra.gmra.mrb[4].mxu1 %v1343_v44  ;;  %1134 = vmatpush3.bf16.msra.mxu0 %v1502_v19 }
  0x45   :  { %1263 = vmatpush3.bf16.msra.mxu1 %v1595_v37  ;;  %1135 = vmatprep.subr.bf16.mxu0 %v1514_v21 }
  0x46   :  { %1264 = vmatprep.subr.bf16.mxu1 %v1364_v34  ;;  %1270 = vmatprep.mubr.msk.bf16.mxu1 %vm1365_vm0, %v1364_v34 }
  0x48   :  { %1136 = vmatpush3.bf16.msra.mxu0 %v1526_v23 }
  0x49   :  { %1265 = vmatpush3.bf16.msra.mxu1 %v1601_v38  ;;  %1137 = vmatprep.subr.bf16.mxu0 %v1538_v25 }
  0x4a   :  { %1266 = vmatprep.subr.bf16.mxu1 %v1364_v34 }
  0x4c   :  { %1138 = vmatpush3.bf16.msra.mxu0 %v1550_v27 }
  0x4d   :  { %1267 = vmatpush3.bf16.msra.mxu1 %v1615_v40  ;;  %1139 = vmatprep.subr.bf16.mxu0 %v1562_v29 }
  0x4e   :  { %1268 = vmatprep.subr.bf16.mxu1 %v1364_v34 }
  0x50   :  { %1140 = vmatpush3.bf16.msra.mxu0 %v1574_v31 }
  0x51   :  { %1269 = vmatpush3.bf16.msra.mxu1 %v1624_v41  ;;  %1152 = vmatprep.subr.bf16.mxu0 %v1389_v0 }
  0x52   :  { %1174 = vmatprep.subr.bf16.mxu1 %v1394_v1 }
  0x53   :  { %570 = vmatmul.mubr.bf16.vlgmr.msra.gmra.mrb[8].mxu0 %v1346_v45 }
  0x54   :  { %1271 = vmatmul.mubr.msk.bf16.vlgmr.msra.gmra.mrb[8].mxu1 %vm334_vm1, %v1349_v46  ;;  %1153 = vmatpush3.bf16.msra.mxu0 %v1400_v2 }
  0x55   :  { %1175 = vmatpush3.bf16.msra.mxu1 %v1406_v3  ;;  %1154 = vmatprep.subr.bf16.mxu0 %v1412_v4 }
  0x56   :  { %1176 = vmatprep.subr.bf16.mxu1 %v1418_v5  ;;  %686 = vmatprep.mubr.bf16.mxu0 %v1352_v47 }
  0x57   :  { %727 = vmatprep.mubr.bf16.mxu1 %v1355_v48 }
  0x58   :  { %1155 = vmatpush3.bf16.msra.mxu0 %v1424_v6 }
  0x59   :  { %1177 = vmatpush3.bf16.msra.mxu1 %v1430_v7  ;;  %1156 = vmatprep.subr.bf16.mxu0 %v1436_v8 }
  0x5a   :  { %1178 = vmatprep.subr.bf16.mxu1 %v1442_v9 }
  0x5c   :  { %1157 = vmatpush3.bf16.msra.mxu0 %v1448_v10 }
  0x5d   :  { %1179 = vmatpush3.bf16.msra.mxu1 %v1454_v11  ;;  %1158 = vmatprep.subr.bf16.mxu0 %v1460_v12 }
  0x5e   :  { %1180 = vmatprep.subr.bf16.mxu1 %v1466_v13 }
  0x60   :  { %1159 = vmatpush3.bf16.msra.mxu0 %v1472_v14 }
  0x61   :  { %1181 = vmatpush3.bf16.msra.mxu1 %v1478_v15  ;;  %1160 = vmatprep.subr.bf16.mxu0 %v1484_v16 }
  0x62   :  { %1182 = vmatprep.subr.bf16.mxu1 %v1490_v17 }
  0x64   :  { %1161 = vmatpush3.bf16.msra.mxu0 %v1496_v18 }
  0x65   :  { %1183 = vmatpush3.bf16.msra.mxu1 %v1502_v19  ;;  %1162 = vmatprep.subr.bf16.mxu0 %v1508_v20 }
  0x66   :  { %1184 = vmatprep.subr.bf16.mxu1 %v1514_v21 }
  0x68   :  { %1163 = vmatpush3.bf16.msra.mxu0 %v1520_v22 }
  0x69   :  { %1185 = vmatpush3.bf16.msra.mxu1 %v1526_v23  ;;  %1164 = vmatprep.subr.bf16.mxu0 %v1532_v24 }
  0x6a   :  { %1186 = vmatprep.subr.bf16.mxu1 %v1538_v25 }
  0x6c   :  { %1165 = vmatpush3.bf16.msra.mxu0 %v1544_v26 }
  0x6d   :  { %1187 = vmatpush3.bf16.msra.mxu1 %v1550_v27  ;;  %1166 = vmatprep.subr.bf16.mxu0 %v1556_v28 }
  0x6e   :  { %1188 = vmatprep.subr.bf16.mxu1 %v1562_v29 }
  0x70   :  { %1167 = vmatpush3.bf16.msra.mxu0 %v1568_v30 }
  0x71   :  { %1189 = vmatpush3.bf16.msra.mxu1 %v1574_v31  ;;  %1274 = vmatprep.subr.bf16.mxu0 %v1364_v34 }
  0x72   :  { %1201 = vmatprep.subr.bf16.mxu1 %v1389_v0 }
  0x73   :  { %687 = vmatmul.mubr.bf16.vlgmr.msra.gmra.mrb[12].mxu0 %v1350_v49 }
  0x74   :  { %728 = vmatmul.mubr.bf16.vlgmr.msra.gmra.mrb[12].mxu1 %v1353_v50  ;;  %1275 = vmatpush3.bf16.msra.mxu0 %v1595_v37 }
  0x75   :  { %1202 = vmatpush3.bf16.msra.mxu1 %v1400_v2  ;;  %1276 = vmatprep.subr.bf16.mxu0 %v1364_v34 }
  0x76   :  { %1203 = vmatprep.subr.bf16.mxu1 %v1412_v4  ;;  %1282 = vmatprep.mubr.msk.bf16.mxu0 %vm1365_vm0, %v1364_v34 }
  0x77   :  { %844 = vmatprep.mubr.bf16.mxu1 %v1359_v51 }
  0x78   :  { %1277 = vmatpush3.bf16.msra.mxu0 %v1601_v38 }
  0x79   :  { %1204 = vmatpush3.bf16.msra.mxu1 %v1424_v6  ;;  %1278 = vmatprep.subr.bf16.mxu0 %v1364_v34 }
  0x7a   :  { %1205 = vmatprep.subr.bf16.mxu1 %v1436_v8 }
  0x7c   :  { %1279 = vmatpush3.bf16.msra.mxu0 %v1615_v40 }
  0x7d   :  { %1206 = vmatpush3.bf16.msra.mxu1 %v1448_v10  ;;  %1280 = vmatprep.subr.bf16.mxu0 %v1364_v34 }
  0x7e   :  { %1207 = vmatprep.subr.bf16.mxu1 %v1460_v12 }
  0x80   :  { %1281 = vmatpush3.bf16.msra.mxu0 %v1624_v41 }
  0x81   :  { %1208 = vmatpush3.bf16.msra.mxu1 %v1472_v14  ;;  %1223 = vmatprep.subr.bf16.mxu0 %v1394_v1 }
  0x82   :  { %1209 = vmatprep.subr.bf16.mxu1 %v1484_v16 }
  0x83   :  { %1283 = vmatmul.mubr.msk.bf16.vlgmr.msra.gmra.mrb[16].mxu0 %vm334_vm1, %v1356_v52 }
  0x84   :  { %1224 = vmatpush3.bf16.msra.mxu0 %v1406_v3  ;;  %885 = vmatprep.mubr.bf16.mxu0 %v1362_v53 }
  0x85   :  { %1210 = vmatpush3.bf16.msra.mxu1 %v1496_v18  ;;  %1225 = vmatprep.subr.bf16.mxu0 %v1418_v5 }
  0x86   :  { %1211 = vmatprep.subr.bf16.mxu1 %v1508_v20 }
  0x88   :  { %1226 = vmatpush3.bf16.msra.mxu0 %v1430_v7 }
  0x89   :  { %1212 = vmatpush3.bf16.msra.mxu1 %v1520_v22  ;;  %1227 = vmatprep.subr.bf16.mxu0 %v1442_v9 }
  0x8a   :  { %1213 = vmatprep.subr.bf16.mxu1 %v1532_v24 }
  0x8c   :  { %1228 = vmatpush3.bf16.msra.mxu0 %v1454_v11 }
  0x8d   :  { %1214 = vmatpush3.bf16.msra.mxu1 %v1544_v26  ;;  %1229 = vmatprep.subr.bf16.mxu0 %v1466_v13 }
  0x8e   :  { %1215 = vmatprep.subr.bf16.mxu1 %v1556_v28 }
  0x90   :  { %1230 = vmatpush3.bf16.msra.mxu0 %v1478_v15 }
  0x91   :  { %1216 = vmatpush3.bf16.msra.mxu1 %v1568_v30  ;;  %1231 = vmatprep.subr.bf16.mxu0 %v1490_v17 }
  0x92   :  { %1286 = vmatprep.subr.bf16.mxu1 %v1364_v34 }
  0x94   :  { %1232 = vmatpush3.bf16.msra.mxu0 %v1502_v19  ;;  %845 = vmatmul.mubr.bf16.vlgmr.msra.gmra.mrb[16].mxu1 %v1357_v54 }
  0x95   :  { %1287 = vmatpush3.bf16.msra.mxu1 %v1595_v37  ;;  %1233 = vmatprep.subr.bf16.mxu0 %v1514_v21 }
  0x96   :  { %1288 = vmatprep.subr.bf16.mxu1 %v1364_v34  ;;  %1294 = vmatprep.mubr.msk.bf16.mxu1 %vm1365_vm0, %v1364_v34 }
  0x98   :  { %1234 = vmatpush3.bf16.msra.mxu0 %v1526_v23 }
  0x99   :  { %1289 = vmatpush3.bf16.msra.mxu1 %v1601_v38  ;;  %1235 = vmatprep.subr.bf16.mxu0 %v1538_v25 }
  0x9a   :  { %1290 = vmatprep.subr.bf16.mxu1 %v1364_v34 }
  0x9c   :  { %1236 = vmatpush3.bf16.msra.mxu0 %v1550_v27 }
  0x9d   :  { %1291 = vmatpush3.bf16.msra.mxu1 %v1615_v40  ;;  %1237 = vmatprep.subr.bf16.mxu0 %v1562_v29 }
  0x9e   :  { %1292 = vmatprep.subr.bf16.mxu1 %v1364_v34 }
  0xa0   :  { %1238 = vmatpush3.bf16.msra.mxu0 %v1574_v31 }
  0xa1   :  { %1293 = vmatpush3.bf16.msra.mxu1 %v1624_v41 }
  0xa3   :  { %886 = vmatmul.mubr.bf16.vlgmr.msra.gmra.mrb[20].mxu0 %v1360_v55 }
  0xa4   :  { %1295 = vmatmul.mubr.msk.bf16.vlgmr.msra.gmra.mrb[20].mxu1 %vm334_vm1, %v1363_v56 }
  0xf6   :  { %v1070_v57 = vpop.f32.mrb[0].mxu0 }
  0xf7   :  { %v1092_v58 = vpop.f32.mrb[0].mxu1  ;;  %v1071_v59 = vpop.f32.mrb[1].mxu0 }
  0xf8   :  { %v1072_v60 = vadd.f32 %v1071_v59, %v1070_v57  ;;  %v1093_v61 = vpop.f32.mrb[1].mxu1  ;;  %v1073_v62 = vpop.f32.mrb[2].mxu0 }
  0xf9   :  { %v1094_v63 = vadd.f32 %v1093_v61, %v1092_v58  ;;  %v1095_v0 = vpop.f32.mrb[2].mxu1  ;;  %v1074_v1 = vpop.f32.mrb[3].mxu0 }
  0xfa   :  { %v1075_v2 = vadd.f32 %v1074_v1, %v1073_v62  ;;  %v1096_v3 = vpop.f32.mrb[3].mxu1 }
  0xfb   :  { %v1097_v4 = vadd.f32 %v1096_v3, %v1095_v0  ;;  %v414_v5 = vadd.f32 %v1094_v63, %v1072_v60 }
  0xfd   :  { %v417_v6 = vadd.f32 %v1097_v4, %v1075_v2 }
 0x106   :  { %v454_v7 = vpop.f32.mrb[4].mxu0 }
 0x107   :  { %v1798_v8 = vadd.f32 %v454_v7, %v414_v5  ;;  %v1260_v9 = vpop.f32.mrb[5].mxu0 }
 0x108   :  { %v457_v10 = vpop.f32.mrb[6].mxu0 }
 0x109   :  { %v1800_v11 = vadd.f32 %v457_v10, %v417_v6  ;;  %v1261_v12 = vpop.f32.mrb[7].mxu0 }
 0x10a   :  { %v1044_v12 = vld [vmem:[%s1812_s2] ss:$0 sm:$0xff] }
 0x117   :  { %v1119_v13 = vpop.f32.mrb[4].mxu1 }
 0x118   :  { %v1120_v14 = vpop.f32.mrb[5].mxu1 }
 0x119   :  { %v1121_v15 = vadd.f32 %v1120_v14, %v1119_v13  ;;  %v1122_v16 = vpop.f32.mrb[6].mxu1 }
 0x11a   :  { %v1123_v17 = vpop.f32.mrb[7].mxu1 }
 0x11b   :  { %v1124_v18 = vadd.f32 %v1123_v17, %v1122_v16 }
 0x126   :  { %v1141_v19 = vpop.f32.mrb[8].mxu0 }
 0x127   :  { %v1142_v20 = vpop.f32.mrb[9].mxu0  ;;  %v612_v21 = vpop.f32.mrb[8].mxu1 }
 0x128   :  { %v1143_v22 = vadd.f32 %v1142_v20, %v1141_v19  ;;  %v1144_v23 = vpop.f32.mrb[10].mxu0  ;;  %v1272_v24 = vpop.f32.mrb[9].mxu1 }
 0x129   :  { %v1145_v25 = vpop.f32.mrb[11].mxu0  ;;  %v615_v26 = vpop.f32.mrb[10].mxu1 }
 0x12a   :  { %v1146_v27 = vadd.f32 %v1145_v25, %v1144_v23  ;;  %v572_v28 = vadd.f32 %v1143_v22, %v1121_v15  ;;  %v1273_v29 = vpop.f32.mrb[11].mxu1 }
 0x12c   :  { %v613_v30 = vadd.f32 %v612_v21, %v572_v28  ;;  %v575_v31 = vadd.f32 %v1146_v27, %v1124_v18 }
 0x12e   :  { %v935_v32 = vmax.f32 %v1798_v8, %v613_v30  ;;  %v616_v33 = vadd.f32 %v615_v26, %v575_v31 }
 0x130   :  { %v936_v34 = vmax.f32 %v1800_v11, %v616_v33 }
 0x146   :  { %v1168_v35 = vpop.f32.mrb[12].mxu0 }
 0x147   :  { %v1190_v36 = vpop.f32.mrb[12].mxu1  ;;  %v1169_v37 = vpop.f32.mrb[13].mxu0 }
 0x148   :  { %v1170_v38 = vadd.f32 %v1169_v37, %v1168_v35  ;;  %v1191_v39 = vpop.f32.mrb[13].mxu1  ;;  %v1171_v40 = vpop.f32.mrb[14].mxu0 }
 0x149   :  { %v1192_v41 = vadd.f32 %v1191_v39, %v1190_v36  ;;  %v1193_v42 = vpop.f32.mrb[14].mxu1  ;;  %v1172_v43 = vpop.f32.mrb[15].mxu0 }
 0x14a   :  { %v1173_v44 = vadd.f32 %v1172_v43, %v1171_v40  ;;  %v1194_v45 = vpop.f32.mrb[15].mxu1 }
 0x14b   :  { %v1195_v46 = vadd.f32 %v1194_v45, %v1193_v42  ;;  %v730_v47 = vadd.f32 %v1192_v41, %v1170_v38 }
 0x14d   :  { %v733_v48 = vadd.f32 %v1195_v46, %v1173_v44 }
 0x156   :  { %v770_v49 = vpop.f32.mrb[16].mxu0 }
 0x157   :  { %v771_v50 = vadd.f32 %v770_v49, %v730_v47  ;;  %v1284_v51 = vpop.f32.mrb[17].mxu0 }
 0x158   :  { %v773_v52 = vpop.f32.mrb[18].mxu0 }
 0x159   :  { %v774_v53 = vadd.f32 %v773_v52, %v733_v48  ;;  %v1285_v54 = vpop.f32.mrb[19].mxu0 }
 0x167   :  { %v1217_v55 = vpop.f32.mrb[16].mxu1 }
 0x168   :  { %v1218_v56 = vpop.f32.mrb[17].mxu1 }
 0x169   :  { %v1219_v57 = vadd.f32 %v1218_v56, %v1217_v55  ;;  %v1220_v58 = vpop.f32.mrb[18].mxu1 }
 0x16a   :  { %v1221_v59 = vpop.f32.mrb[19].mxu1 }
 0x16b   :  { %v1222_v60 = vadd.f32 %v1221_v59, %v1220_v58 }
 0x176   :  { %v1239_v61 = vpop.f32.mrb[20].mxu0 }
 0x177   :  { %v1240_v62 = vpop.f32.mrb[21].mxu0  ;;  %v928_v63 = vpop.f32.mrb[20].mxu1 }
 0x178   :  { %v1241_v0 = vadd.f32 %v1240_v62, %v1239_v61  ;;  %v1242_v1 = vpop.f32.mrb[22].mxu0  ;;  %v1296_v2 = vpop.f32.mrb[21].mxu1 }
 0x179   :  { %v1243_v3 = vpop.f32.mrb[23].mxu0  ;;  %v931_v4 = vpop.f32.mrb[22].mxu1 }
 0x17a   :  { %v888_v5 = vadd.f32 %v1241_v0, %v1219_v57  ;;  %v1244_v6 = vadd.f32 %v1243_v3, %v1242_v1  ;;  %v1297_v7 = vpop.f32.mrb[23].mxu1 }
 0x17c   :  { %v929_v8 = vadd.f32 %v928_v63, %v888_v5  ;;  %v891_v9 = vadd.f32 %v1244_v6, %v1222_v60 }
 0x17e   :  { %v937_v10 = vmax.f32 %v771_v50, %v929_v8  ;;  %v932_v11 = vadd.f32 %v931_v4, %v891_v9 }
 0x180   :  { %v939_v13 = vmax.f32 %v935_v32, %v937_v10  ;;  %v938_v14 = vmax.f32 %v774_v53, %v932_v11 }
 0x182   :  { %v948_v15 = vadd.f32 %v1044_v12, %v939_v13  ;;  %v940_v16 = vmax.f32 %v936_v34, %v938_v14 }
 0x184   :  { %v949_v17 = vadd.f32 %v1044_v12, %v940_v16  ;;  %v950_v18 = vmax.f32 %v948_v15, 0.0 }
 0x186   :  { %v951_v19 = vmax.f32 %v949_v17, 0.0 }
 0x188   :  { %v1052_v20 = vpack.c.bf16 %v951_v19, %v950_v18 }
 0x18a   :  { %1053 = vst [vmem:[%s1813_s3] sm:$0xff] %v1052_v20  }

// kernel: cnn_phoneme_forward.7
= control target key start
LH: loop header
LB: loop body
LE: loop exit
PB: predicated region body
PF: predicated region fallthrough
CT: control target
= control target key end

     0   :  { %v721_v2 = vmov 0.0   ;;  %v105_v31 = vlaneseq  ;;  %v722_v35 = vmov 1966171168   ;;  %s906_s0 = inlined_call_operand.vmem [shape: bf16[2,512], index: 0, kind: input, shape index: {}]   ;;  %s907_s1 = inlined_call_operand.vmem [shape: bf16[512,128], index: 1, kind: input, shape index: {}]   ;;  %s908_s2 = inlined_call_operand.vmem [shape: f32[1,128], index: 2, kind: input, shape index: {}]   ;;  %s909_s3 = inlined_call_operand.vmem [shape: bf16[128,39], index: 3, kind: input, shape index: {}]   ;;  %s910_s4 = inlined_call_operand.vmem [shape: f32[1,39], index: 4, kind: input, shape index: {}]   ;;  %s911_s5 = inlined_call_operand.hbm [shape: f32[2,39], index: 5, kind: output, shape index: {}]  }
   0x1   :  { %v657_v0 = vld [vmem:[%s907_s1 + $0x40] sm:$0xff]   ;;  %26 = vst [vmem:[#allocation2] sm:$0x3] %v721_v2  ;;  %v661_v5 = vld [vmem:[%s907_s1 + $0x48] sm:$0xff]   ;;  %v665_v9 = vld [vmem:[%s907_s1 + $0x50] sm:$0xff]   ;;  %v103_v36 = vunpack.c.l.s4 %v722_v35 }
   0x2   :  { %v658_v1 = vld [vmem:[%s907_s1 + $0xc0] sm:$0xff]   ;;  %580 = vmatprep.subr.bf16.mxu0 %v657_v0  ;;  %v662_v6 = vld [vmem:[%s907_s1 + $0xc8] sm:$0xff]   ;;  %v666_v10 = vld [vmem:[%s907_s1 + $0xd0] sm:$0xff]   ;;  %v106_v37 = vshrl.u32 %v105_v31, 7 }
   0x3   :  { %v659_v3 = vld [vmem:[%s907_s1] sm:$0xff]   ;;  %602 = vmatprep.subr.bf16.mxu1 %v658_v1  ;;  %v663_v7 = vld [vmem:[%s907_s1 + $0x8] sm:$0xff]   ;;  %v667_v11 = vld [vmem:[%s907_s1 + $0x10] sm:$0xff]   ;;  %v104_v39 = vunpack.c.0.s8 %v103_v36 }
   0x4   :  { %v660_v4 = vld [vmem:[%s907_s1 + $0x80] sm:$0xff]   ;;  %581 = vmatpush3.bf16.msra.mxu0 %v659_v3  ;;  %v664_v8 = vld [vmem:[%s907_s1 + $0x88] sm:$0xff]   ;;  %v668_v12 = vld [vmem:[%s907_s1 + $0x90] sm:$0xff]  }
   0x5   :  { %603 = vmatpush3.bf16.msra.mxu1 %v660_v4  ;;  %582 = vmatprep.subr.bf16.mxu0 %v661_v5  ;;  %v669_v13 = vld [vmem:[%s907_s1 + $0x58] sm:$0xff]   ;;  %v673_v17 = vld [vmem:[%s907_s1 + $0x60] sm:$0xff]   ;;  %v677_v21 = vld [vmem:[%s907_s1 + $0x68] sm:$0xff]   ;;  %v107_v40 = vsub.s32 %v104_v39, %v106_v37 }
   0x6   :  { %604 = vmatprep.subr.bf16.mxu1 %v662_v6  ;;  %v670_v14 = vld [vmem:[%s907_s1 + $0xd8] sm:$0xff]   ;;  %v674_v18 = vld [vmem:[%s907_s1 + $0xe0] sm:$0xff]   ;;  %v678_v22 = vld [vmem:[%s907_s1 + $0xe8] sm:$0xff]  }
   0x7   :  { %v671_v15 = vld [vmem:[%s907_s1 + $0x18] sm:$0xff]   ;;  %v675_v19 = vld [vmem:[%s907_s1 + $0x20] sm:$0xff]   ;;  %v679_v23 = vld [vmem:[%s907_s1 + $0x28] sm:$0xff]  }
   0x8   :  { %583 = vmatpush3.bf16.msra.mxu0 %v663_v7  ;;  %v672_v16 = vld [vmem:[%s907_s1 + $0x98] sm:$0xff]   ;;  %v676_v20 = vld [vmem:[%s907_s1 + $0xa0] sm:$0xff]   ;;  %v680_v24 = vld [vmem:[%s907_s1 + $0xa8] sm:$0xff]  }
   0x9   :  { %605 = vmatpush3.bf16.msra.mxu1 %v664_v8  ;;  %584 = vmatprep.subr.bf16.mxu0 %v665_v9  ;;  %v681_v25 = vld [vmem:[%s907_s1 + $0x70] sm:$0xff]   ;;  %v685_v29 = vld [vmem:[%s907_s1 + $0x78] sm:$0xff]   ;;  %v537_v34 = vld.sshfl [vmem:[%s906_s0] sm:$0x33 pattern:$0x75316420] }
   0xa   :  { %606 = vmatprep.subr.bf16.mxu1 %v666_v10  ;;  %v682_v26 = vld [vmem:[%s907_s1 + $0xf0] sm:$0xff]   ;;  %v686_v30 = vld [vmem:[%s907_s1 + $0xf8] sm:$0xff]   ;;  %v101_v38 = vcombine.high %v537_v34, %v537_v34  ;;  %v108_v42 = vrot.slane %v537_v34, %v107_v40  ;;  %v689_v43 = vld [vmem:[%s909_s3] sm:$0xff]  }
   0xb   :  { %v683_v27 = vld [vmem:[%s907_s1 + $0x30] sm:$0xff]   ;;  %v687_v32 = vld [vmem:[%s907_s1 + $0x38] sm:$0xff]  }
   0xc   :  { %585 = vmatpush3.bf16.msra.mxu0 %v667_v11  ;;  %v684_v28 = vld [vmem:[%s907_s1 + $0xb0] sm:$0xff]   ;;  %v688_v33 = vld [vmem:[%s907_s1 + $0xb8] sm:$0xff]   ;;  %v115_v41 = vrot.slane %v101_v38, %v107_v40 }
   0xd   :  { %607 = vmatpush3.bf16.msra.mxu1 %v668_v12  ;;  %586 = vmatprep.subr.bf16.mxu0 %v669_v13 }
   0xe   :  { %608 = vmatprep.subr.bf16.mxu1 %v670_v14 }
  0x10   :  { %587 = vmatpush3.bf16.msra.mxu0 %v671_v15 }
  0x11   :  { %609 = vmatpush3.bf16.msra.mxu1 %v672_v16  ;;  %588 = vmatprep.subr.bf16.mxu0 %v673_v17 }
  0x12   :  { %610 = vmatprep.subr.bf16.mxu1 %v674_v18 }
  0x14   :  { %589 = vmatpush3.bf16.msra.mxu0 %v675_v19 }
  0x15   :  { %611 = vmatpush3.bf16.msra.mxu1 %v676_v20  ;;  %590 = vmatprep.subr.bf16.mxu0 %v677_v21 }
  0x16   :  { %612 = vmatprep.subr.bf16.mxu1 %v678_v22 }
  0x18   :  { %591 = vmatpush3.bf16.msra.mxu0 %v679_v23 }
  0x19   :  { %613 = vmatpush3.bf16.msra.mxu1 %v680_v24  ;;  %592 = vmatprep.subr.bf16.mxu0 %v681_v25 }
  0x1a   :  { %614 = vmatprep.subr.bf16.mxu1 %v682_v26 }
  0x1c   :  { %593 = vmatpush3.bf16.msra.mxu0 %v683_v27 }
  0x1d   :  { %615 = vmatpush3.bf16.msra.mxu1 %v684_v28  ;;  %594 = vmatprep.subr.bf16.mxu0 %v685_v29 }
  0x1e   :  { %616 = vmatprep.subr.bf16.mxu1 %v686_v30 }
  0x20   :  { %595 = vmatpush3.bf16.msra.mxu0 %v687_v32 }
  0x21   :  { %617 = vmatpush3.bf16.msra.mxu1 %v688_v33  ;;  %633 = vmatprep.subr.bf16.mxu0 %v721_v2 }
  0x22   :  { %10 = vsyncpa [#allocation4], 0  ;;  %346 = vmatprep.mubr.bf16.mxu0 %v115_v41  ;;  %v117_v44 = vcombine.high %v115_v41, %v115_v41  ;;  %v116_v45 = vcombine.high %v108_v42, %v108_v42  ;;  %v690_v46 = vld [vmem:[%s909_s3 + $0x8] sm:$0xff]   ;;  %v691_v47 = vld [vmem:[%s909_s3 + $0x10] sm:$0xff]   ;;  %vm723_vm0 = vmmov 0   ;;  %s724_s26 = smov [#allocation3]  }
  0x23   :  { %347 = vmatmul.mubr.bf16.vlgmr.msra.gmra.mrb[0].mxu0 %v108_v42  ;;  %v692_v48 = vld [vmem:[%s909_s3 + $0x18] sm:$0xff]   ;;  %v693_v49 = vld [vmem:[%s909_s3 + $0x20] sm:$0xff]   ;;  %v694_v50 = vld [vmem:[%s909_s3 + $0x28] sm:$0xff]   ;;  %s529_s27 = sshll.u32 %s724_s26, 4  ;;  %vm521_vm1 = vcmask 312320   ;;  %s530_s27 = int_to_ptr.vmem [resolvable:$true] %s529_s27 }
  0x24   :  { %386 = vmatprep.mubr.bf16.mxu1 %v117_v44  ;;  %634 = vmatpush3.bf16.msra.mxu0 %v689_v43  ;;  %v695_v51 = vld [vmem:[%s909_s3 + $0x30] sm:$0xff]   ;;  %v696_v52 = vld [vmem:[%s909_s3 + $0x38] sm:$0xff]   ;;  %v27_v62 = vld [vmem:[#allocation2] sm:$0x3]  ;;  %p702_p1 = scmp.lt.s32.totalorder %s530_s27, %s530_s27 }
  0x25   :  { %387 = vmatmul.mubr.bf16.vlgmr.msra.gmra.mrb[0].mxu1 %v116_v45  ;;  %635 = vmatprep.subr.bf16.mxu0 %v721_v2  ;;  %v570_v3 = vld [vmem:[%s908_s2] ss:$0 sm:$0xff]  ;;  %s697_s2 = scalar_lea.vmem %s530_s27, 32 }
  0x26   :  { %649 = vmatprep.mubr.msk.bf16.mxu0 %vm723_vm0, %v721_v2  ;;  %v571_v7 = vld [vmem:[%s910_s4] ss:$0 sm:$0xff]  ;;  %p698_p0 = scmp.ne.s32.totalorder %s530_s27, %s697_s2  ;;  %p703_p2 = scmp.lt.s32.totalorder %s697_s2, %s697_s2 }
  0x28   :  { %636 = vmatpush3.bf16.msra.mxu0 %v690_v46  ;;  %p704_p3 = por %p703_p2, %p702_p1 }
  0x29   :  { %637 = vmatprep.subr.bf16.mxu0 %v721_v2 }
  0x2a   :  { %p705_p4 = pnand %p704_p3, %p698_p0 }
  0x2c   :  { %638 = vmatpush3.bf16.msra.mxu0 %v691_v47 }
  0x2d   :  { %639 = vmatprep.subr.bf16.mxu0 %v721_v2 }
  0x30   :  { %640 = vmatpush3.bf16.msra.mxu0 %v692_v48 }
  0x31   :  { %641 = vmatprep.subr.bf16.mxu0 %v721_v2 }
  0x34   :  { %642 = vmatpush3.bf16.msra.mxu0 %v693_v49 }
  0x35   :  { %643 = vmatprep.subr.bf16.mxu0 %v721_v2 }
  0x38   :  { %644 = vmatpush3.bf16.msra.mxu0 %v694_v50 }
  0x39   :  { %645 = vmatprep.subr.bf16.mxu0 %v721_v2 }
  0x3c   :  { %646 = vmatpush3.bf16.msra.mxu0 %v695_v51 }
  0x3d   :  { %647 = vmatprep.subr.bf16.mxu0 %v721_v2 }
  0x40   :  { %648 = vmatpush3.bf16.msra.mxu0 %v696_v52 }
  0xf6   :  { %v596_v53 = vpop.f32.mrb[0].mxu0 }
  0xf7   :  { %v597_v54 = vpop.f32.mrb[1].mxu0 }
  0xf8   :  { %v618_v55 = vpop.f32.mrb[0].mxu1  ;;  %v598_v56 = vadd.f32 %v597_v54, %v596_v53  ;;  %v599_v57 = vpop.f32.mrb[2].mxu0 }
  0xf9   :  { %v619_v58 = vpop.f32.mrb[1].mxu1  ;;  %v600_v59 = vpop.f32.mrb[3].mxu0 }
  0xfa   :  { %v620_v60 = vadd.f32 %v619_v58, %v618_v55  ;;  %v621_v61 = vpop.f32.mrb[2].mxu1 }
  0xfb   :  { %v622_v63 = vpop.f32.mrb[3].mxu1 }
  0xfc   :  { %v389_v0 = vadd.f32 %v620_v60, %v598_v56 }
  0xfe   :  { %v394_v1 = vadd.f32 %v389_v0, %v27_v62 }
 0x100   :  { %395 = vst [vmem:[#allocation2] sm:$0x3] %v394_v1 }
 0x107   :  { %v399_v2 = vld [vmem:[#allocation2] sm:$0x3] }
 0x108   :  { %v407_v4 = vadd.f32 %v570_v3, %v399_v2 }
 0x10a   :  { %v408_v5 = vmax.f32 %v407_v4, 0.0 }
 0x10c   :  { %v409_v6 = vpack.c.bf16 %v408_v5, %v408_v5 }
 0x10e   :  { %650 = vmatmul.mubr.bf16.vlgmr.msra.gmra.mrb[4].mxu0 %v409_v6 }
 0x1e1   :  { %v515_v8 = vpop.f32.mrb[4].mxu0 }
 0x1e2   :  { %v516_v9 = vadd.f32 %v571_v7, %v515_v8  ;;  %v651_v10 = vpop.f32.mrb[5].mxu0 }
 0x1e3   :  { %v518_v11 = vpop.f32.mrb[6].mxu0 }
 0x1e4   :  { %v652_v12 = vpop.f32.mrb[7].mxu0  ;;  %522 = vst.msk [vmem:[#allocation3] sm:$0x3] %vm521_vm1, %v516_v9 }
 0x1e5   :  { %708 = shalt.err (!%p705_p4)
}
 0x1e6   :  { %s709_s4 = scalar_lea.hbm %s911_s5, 32 }
 0x1e7   :  { %p710_p5 = scmp.ne.s32.totalorder %s911_s5, %s709_s4  ;;  %p713_p6 = scmp.lt.u32.totalorder %s709_s4, %s911_s5 }
 0x1e9   :  { %p715_p7 = pnand %p713_p6, %p710_p5 }
 0x1eb   :  { %718 = shalt.err (!%p715_p7)
}
 0x1ec   :  { %532 = dma.vmem_to_hbm [thread:$0]  %s530_s27, 32, %s911_s5, [#allocation4]  }
 0x1ed   :  { %719 = dma.done.wait [#allocation4], 32  }
 0x1ee   :  { %720 = vsyncadd [#allocation4], 4294967264 }
 0x1ef   :  { %536 = vsyncpa [#allocation4], 1 }

</bundles_post_ra>
